<compile_context>
chip_gen: v7x
topology: tpu7x:2x2x1
jax: 0.10.0
libtpu: 0.0.40
codegen_flags: <defaults>
</compile_context>

<pallas_src>
import functools

import jax
import jax.numpy as jnp
from jax.experimental import pallas as pl
from jax.experimental.pallas import tpu as pltpu


_LANE = 128
_TARGET_BLOCK_BYTES = 8 * 1024 * 1024       # target bytes per input block
_MAX_SINGLE_COL_BLOCK_BYTES = 12 * 1024 * 1024  # above this, column-tile H*W


def _round_up(x: int, m: int) -> int:
    return (x + m - 1) // m * m


def _sublane(dtype) -> int:
    """Minimum sublane tile for a dtype (sub-32-bit dtypes pack along sublanes)."""
    itemsize = jnp.dtype(dtype).itemsize
    if itemsize >= 4:
        return 8
    if itemsize == 2:
        return 16
    return 32


def _mse_rowsum_kernel(pred_ref, gt_ref, num_ref, den_ref):
    """Common case: block covers the full H*W extent; one shot per row tile."""
    pred = pred_ref[...].astype(jnp.float32)          # (tr, hw)
    gt = gt_ref[...].astype(jnp.float32)              # (tr, hw)
    diff = pred - gt
    sq_sum = jnp.sum(diff * diff, axis=1, keepdims=True)   # (tr, 1)
    gt_sum = jnp.sum(gt, axis=1, keepdims=True)             # (tr, 1)
    mask = gt_sum > 0
    num_ref[...] = jnp.where(mask, sq_sum, 0.0)        # masked sum of sq. error
    den_ref[...] = jnp.where(mask, 1.0, 0.0)           # per-row mask


def _mse_rowsum_coltiled_kernel(hw, tc, pred_ref, gt_ref, num_ref, den_ref):
    """Fallback for very large H*W: accumulate over column tiles."""
    j = pl.program_id(1)

    @pl.when(j == 0)
    def _():
        num_ref[...] = jnp.zeros_like(num_ref)
        den_ref[...] = jnp.zeros_like(den_ref)

    pred = pred_ref[...].astype(jnp.float32)           # (tr, tc)
    gt = gt_ref[...].astype(jnp.float32)               # (tr, tc)
    # Ragged column tail: block contents past hw are undefined (possibly NaN),
    # so select them away (never multiply-by-mask).
    col = jax.lax.broadcasted_iota(jnp.int32, pred.shape, 1) + j * tc
    valid = col < hw
    diff = jnp.where(valid, pred - gt, 0.0)
    gt_m = jnp.where(valid, gt, 0.0)

    num_ref[...] += jnp.sum(diff * diff, axis=1, keepdims=True)
    den_ref[...] += jnp.sum(gt_m, axis=1, keepdims=True)

    @pl.when(j == pl.num_programs(1) - 1)
    def _():
        mask = den_ref[...] > 0
        num_ref[...] = jnp.where(mask, num_ref[...], 0.0)
        den_ref[...] = jnp.where(mask, 1.0, 0.0)


def heatmap_loss_mse(pred: jax.Array, gt: jax.Array) -> jax.Array:
    """Pallas implementation of HeatmapLoss(loss_type='MSE').forward(pred, gt).

    pred, gt: (B, C, H, W). Returns a float32 scalar.
    """
    assert pred.shape == gt.shape, (
        f"pred, gt heatmap size mismatch: {pred.shape}|{gt.shape}")
    B, C, H, W = pred.shape
    hw = H * W
    R = B * C
    itemsize = max(jnp.dtype(pred.dtype).itemsize, jnp.dtype(gt.dtype).itemsize)
    sub = max(_sublane(pred.dtype), _sublane(gt.dtype))

    # Lane-dense flattened view: one row per (b, c) heatmap (free reshape).
    pred2 = pred.reshape(R, hw)
    gt2 = gt.reshape(R, hw)

    single_col = sub * hw * itemsize <= _MAX_SINGLE_COL_BLOCK_BYTES
    if single_col:
        tc = hw                     # full extent: exempt from 128-divisibility
        n_col_tiles = 1
    else:
        tc = max(_LANE,
                 (_TARGET_BLOCK_BYTES // (sub * itemsize)) // _LANE * _LANE)
        tc = min(tc, _round_up(hw, _LANE))
        n_col_tiles = pl.cdiv(hw, tc)

    # Row tile: multiple of the dtype's sublane count, sized so each input
    # block is ~_TARGET_BLOCK_BYTES, but capped so the parallel row axis has
    # >= 4 blocks when R allows (keeps both v7x TensorCores busy).
    tr = max(sub, (_TARGET_BLOCK_BYTES // (tc * itemsize)) // sub * sub)
    tr = min(tr, max(sub, _round_up(pl.cdiv(R, 4), sub)))
    tr = min(tr, _round_up(R, sub))
    n_row_tiles = pl.cdiv(R, tr)

    # 2 inputs x 2 pipeline buffers x block, plus slack for the tiny outputs.
    # Block bytes never exceed ~12 MiB by construction, so this stays well
    # inside v7x's 64 MiB/TC VMEM.
    block_bytes = tr * tc * itemsize
    vmem_limit = int(max(32 * 1024 * 1024, 4 * block_bytes + 2 * 1024 * 1024))

    if single_col:
        kernel = _mse_rowsum_kernel
        grid = (n_row_tiles,)
        in_specs = [pl.BlockSpec((tr, tc), lambda i: (i, 0)),
                    pl.BlockSpec((tr, tc), lambda i: (i, 0))]
        out_specs = [pl.BlockSpec((tr, 1), lambda i: (i, 0)),
                     pl.BlockSpec((tr, 1), lambda i: (i, 0))]
        dims = ("parallel",)
    else:
        kernel = functools.partial(_mse_rowsum_coltiled_kernel, hw, tc)
        grid = (n_row_tiles, n_col_tiles)
        in_specs = [pl.BlockSpec((tr, tc), lambda i, j: (i, j)),
                    pl.BlockSpec((tr, tc), lambda i, j: (i, j))]
        out_specs = [pl.BlockSpec((tr, 1), lambda i, j: (i, 0)),
                     pl.BlockSpec((tr, 1), lambda i, j: (i, 0))]
        dims = ("parallel", "arbitrary")

    num_out, den_out = pl.pallas_call(
        kernel,
        out_shape=(jax.ShapeDtypeStruct((R, 1), jnp.float32),
                   jax.ShapeDtypeStruct((R, 1), jnp.float32)),
        grid_spec=pltpu.PrefetchScalarGridSpec(
            num_scalar_prefetch=0,
            grid=grid,
            in_specs=in_specs,
            out_specs=out_specs,
        ),
        compiler_params=pltpu.CompilerParams(
            dimension_semantics=dims,
            vmem_limit_bytes=vmem_limit,
        ),
    )(pred2, gt2)

    # Tiny final reduction + normalization in plain JAX.
    num = jnp.sum(num_out) / float(hw)   # == sum over (b,c) of mean * mask
    den = jnp.sum(den_out)               # == mask.sum()
    return num / den


def _heatmap_loss_mse_ref(pred, gt):
    pred = pred.astype(jnp.float32)
    gt = gt.astype(jnp.float32)
    mask = (gt.sum(axis=(2, 3)) > 0).astype(jnp.float32)
    per_bc = jnp.mean((pred - gt) ** 2, axis=(2, 3))
    return jnp.sum(per_bc * mask) / jnp.sum(mask)


if __name__ == "__main__":
    B, C, H, W = 2, 4, 16, 16
    key = jax.random.PRNGKey(0)
    k_pred, k_gt, k_keep = jax.random.split(key, 3)

    pred = jax.random.uniform(k_pred, (B, C, H, W), dtype=jnp.float32)
    gt = jax.random.uniform(k_gt, (B, C, H, W), dtype=jnp.float32)
    # Zero out some (b, c) heatmaps so the mask is non-trivial.
    keep = (jax.random.uniform(k_keep, (B, C, 1, 1)) > 0.4).astype(jnp.float32)
    gt = gt * keep

    loss = heatmap_loss_mse(pred, gt)
    jax.block_until_ready(loss)

    ref = _heatmap_loss_mse_ref(pred, gt)
    assert jnp.allclose(loss, ref, rtol=1e-5, atol=1e-6), (loss, ref)

    print("KERNEL_OK")
</pallas_src>

<mosaic_0001>
module attributes {stable_mosaic.version = 11 : i64} {
  func.func @_mse_rowsum_kernel(%arg0: i32, %arg1: memref<8x256xf32, #tpu.memory_space<vmem>>, %arg2: memref<8x256xf32, #tpu.memory_space<vmem>>, %arg3: memref<8x1xf32, #tpu.memory_space<vmem>>, %arg4: memref<8x1xf32, #tpu.memory_space<vmem>>) attributes {dimension_semantics = [#tpu.dimension_semantics<parallel>], iteration_bounds = array<i64: 1>, scalar_prefetch = 0 : i64, scratch_operands = 0 : i64, tpu.core_type = #tpu.core_type<tc>, window_params = [{transform_indices = @transform_0, window_bounds = array<i64: 8, 256>}, {transform_indices = @transform_1, window_bounds = array<i64: 8, 256>}, {transform_indices = @transform_2, window_bounds = array<i64: 8, 1>}, {transform_indices = @transform_3, window_bounds = array<i64: 8, 1>}]} {
    %c0 = arith.constant 0 : index
    %c0_0 = arith.constant 0 : index
    %0 = vector.load %arg1[%c0, %c0_0] : memref<8x256xf32, #tpu.memory_space<vmem>>, vector<8x256xf32>
    %c0_1 = arith.constant 0 : index
    %c0_2 = arith.constant 0 : index
    %1 = vector.load %arg2[%c0_1, %c0_2] : memref<8x256xf32, #tpu.memory_space<vmem>>, vector<8x256xf32>
    %2 = arith.subf %0, %1 : vector<8x256xf32>
    %3 = arith.mulf %2, %2 : vector<8x256xf32>
    %cst = arith.constant dense<0.000000e+00> : vector<8xf32>
    %4 = vector.multi_reduction <add>, %3, %cst [1] : vector<8x256xf32> to vector<8xf32>
    %5 = vector.shape_cast %4 : vector<8xf32> to vector<8x1xf32>
    %cst_3 = arith.constant dense<0.000000e+00> : vector<8xf32>
    %6 = vector.multi_reduction <add>, %1, %cst_3 [1] : vector<8x256xf32> to vector<8xf32>
    %7 = vector.shape_cast %6 : vector<8xf32> to vector<8x1xf32>
    %cst_4 = arith.constant 0.000000e+00 : f32
    %8 = vector.broadcast %cst_4 : f32 to vector<8x1xf32>
    %9 = arith.cmpf ogt, %7, %8 : vector<8x1xf32>
    %cst_5 = arith.constant 0.000000e+00 : f32
    %10 = vector.broadcast %cst_5 : f32 to vector<8x1xf32>
    %11 = arith.select %9, %5, %10 : vector<8x1xi1>, vector<8x1xf32>
    %c0_6 = arith.constant 0 : index
    %c0_7 = arith.constant 0 : index
    %12 = vector.load %arg3[%c0_6, %c0_7] : memref<8x1xf32, #tpu.memory_space<vmem>>, vector<8x1xf32>
    tpu.vector_store %arg3[%c0_6, %c0_7], %11 {strides = array<i32>} : memref<8x1xf32, #tpu.memory_space<vmem>>, vector<8x1xf32>,
    %cst_8 = arith.constant 1.000000e+00 : f32
    %cst_9 = arith.constant 0.000000e+00 : f32
    %13 = vector.broadcast %cst_8 : f32 to vector<8x1xf32>
    %14 = vector.broadcast %cst_9 : f32 to vector<8x1xf32>
    %15 = arith.select %9, %13, %14 : vector<8x1xi1>, vector<8x1xf32>
    %c0_10 = arith.constant 0 : index
    %c0_11 = arith.constant 0 : index
    %16 = vector.load %arg4[%c0_10, %c0_11] : memref<8x1xf32, #tpu.memory_space<vmem>>, vector<8x1xf32>
    tpu.vector_store %arg4[%c0_10, %c0_11], %15 {strides = array<i32>} : memref<8x1xf32, #tpu.memory_space<vmem>>, vector<8x1xf32>,
    return
  }
  func.func @transform_0(%arg0: i32) -> (i32, i32) {
    %c0_i32 = arith.constant 0 : i32
    %c0_i32_0 = arith.constant 0 : i32
    return %arg0, %c0_i32 : i32, i32
  }
  func.func @transform_1(%arg0: i32) -> (i32, i32) {
    %c0_i32 = arith.constant 0 : i32
    %c0_i32_0 = arith.constant 0 : i32
    return %arg0, %c0_i32 : i32, i32
  }
  func.func @transform_2(%arg0: i32) -> (i32, i32) {
    %c0_i32 = arith.constant 0 : i32
    %c0_i32_0 = arith.constant 0 : i32
    return %arg0, %c0_i32 : i32, i32
  }
  func.func @transform_3(%arg0: i32) -> (i32, i32) {
    %c0_i32 = arith.constant 0 : i32
    %c0_i32_0 = arith.constant 0 : i32
    return %arg0, %c0_i32 : i32, i32
  }
}

</mosaic_0001>

<bundles_post_ra>
// kernel: tpu_custom_call.1
= control target key start
LH: loop header
LB: loop body
LE: loop exit
PB: predicated region body
PF: predicated region fallthrough
CT: control target
= control target key end

     0   :  { %9 = vsyncpa [#allocation3], 0  ;;  %s171_s0 = inlined_call_operand.hbm [shape: f32[8,256], index: 0, kind: input, shape index: {}]   ;;  %s172_s1 = inlined_call_operand.hbm [shape: f32[8,256], index: 1, kind: input, shape index: {}]   ;;  %s173_s2 = inlined_call_operand.vmem [shape: f32[8,1], index: 2, kind: output, shape index: {0}]   ;;  %s174_s3 = inlined_call_operand.vmem [shape: f32[8,1], index: 3, kind: output, shape index: {1}]  }
   0x1   :  { %10 = vsyncpa [#allocation5], 0  ;;  %s118_s12 = smov [#allocation2]   ;;  %s119_s14 = smov [#allocation4]  }
   0x2   :  { %s17_s13 = sshll.u32 %s118_s12, 4  ;;  %s27_s15 = sshll.u32 %s119_s14, 4  ;;  %s18_s13 = int_to_ptr.vmem [resolvable:$true] %s17_s13  ;;  %s28_s15 = int_to_ptr.vmem [resolvable:$true] %s27_s15 }
   0x3   :  { %s70_s18 = scalar_lea.hbm %s171_s0, 256 }
   0x4   :  { %p71_p0 = scmp.ne.s32.totalorder %s171_s0, %s70_s18  ;;  %p74_p1 = scmp.lt.u32.totalorder %s70_s18, %s171_s0 }
   0x6   :  { %p76_p2 = pnand %p74_p1, %p71_p0 }
   0x8   :  { %79 = shalt.err (!%p76_p2)
}
   0x9   :  { %s80_s23 = scalar_lea.vmem %s18_s13, 256  ;;  %p85_p4 = scmp.lt.s32.totalorder %s18_s13, %s18_s13 }
   0xa   :  { %p81_p3 = scmp.ne.s32.totalorder %s18_s13, %s80_s23  ;;  %p86_p5 = scmp.lt.s32.totalorder %s80_s23, %s80_s23 }
   0xc   :  { %p87_p6 = por %p86_p5, %p85_p4 }
   0xe   :  { %p88_p7 = pnand %p87_p6, %p81_p3 }
  0x10   :  { %91 = shalt.err (!%p88_p7)
}
  0x11   :  { %20 = dma.hbm_to_vmem [thread:$0]  %s171_s0, 256, %s18_s13, [#allocation3]  }
  0x12   :  { %s92_s28 = scalar_lea.hbm %s172_s1, 256 }
  0x13   :  { %p93_p8 = scmp.ne.s32.totalorder %s172_s1, %s92_s28  ;;  %p96_p9 = scmp.lt.u32.totalorder %s92_s28, %s172_s1 }
  0x15   :  { %p98_p10 = pnand %p96_p9, %p93_p8 }
  0x17   :  { %101 = shalt.err (!%p98_p10)
}
  0x18   :  { %s102_s6 = scalar_lea.vmem %s28_s15, 256  ;;  %p107_p12 = scmp.lt.s32.totalorder %s28_s15, %s28_s15 }
  0x19   :  { %p103_p11 = scmp.ne.s32.totalorder %s28_s15, %s102_s6  ;;  %p108_p13 = scmp.lt.s32.totalorder %s102_s6, %s102_s6 }
  0x1b   :  { %p109_p0 = por %p108_p13, %p107_p12 }
  0x1d   :  { %p110_p1 = pnand %p109_p0, %p103_p11 }
  0x1f   :  { %113 = shalt.err (!%p110_p1)
}
  0x20   :  { %30 = dma.hbm_to_vmem [thread:$0]  %s172_s1, 256, %s28_s15, [#allocation5]  }
  0x21   :  { %114 = dma.done.wait [#allocation3], 256  }
  0x22   :  { %115 = vsyncadd [#allocation3], 4294967040 }
  0x23   :  { %116 = dma.done.wait [#allocation5], 256  }
  0x24   :  { %117 = vsyncadd [#allocation5], 4294967040  ;;  %v39_v0 = vld [vmem:[#allocation4] sm:$0xff]  ;;  %v40_v1 = vld [vmem:[#allocation4 + $0x8] sm:$0xff]  ;;  %vm53_vm0 = vcmask 7168   ;;  %v120_v11 = vmov 0.0  }
  0x25   :  { %v37_v2 = vld [vmem:[#allocation2] sm:$0xff]  ;;  %v48_v3 = vadd.f32 %v40_v1, %v39_v0  ;;  %v38_v4 = vld [vmem:[#allocation2 + $0x8] sm:$0xff] }
  0x26   :  { %v41_v5 = vsub.f32 %v37_v2, %v39_v0  ;;  %v42_v6 = vsub.f32 %v38_v4, %v40_v1 }
  0x27   :  { %49 = vadd.xlane.f32.xlu0 %v48_v3 }
  0x28   :  { %v43_v7 = vmul.f32 %v41_v5, %v41_v5  ;;  %v44_v8 = vmul.f32 %v42_v6, %v42_v6 }
  0x2a   :  { %v45_v9 = vadd.f32 %v44_v8, %v43_v7 }
  0x2c   :  { %46 = vadd.xlane.f32.xlu0 %v45_v9 }
  0xb4   :  { %v50_v10 = vpop.xlane.xlu0 %49 }
  0xb5   :  { %vm51_vm1 = vcmp.gt.f32.partialorder %v50_v10, 0.0 }
  0xb6   :  { %v55_v12 = vsel %vm51_vm1, 1.0, %v120_v11 }
  0xb7   :  { %56 = vst.msk [vmem:[%s174_s3] sm:$0xff] %vm53_vm0, %v55_v12 }
  0xb9   :  { %v47_v13 = vpop.xlane.xlu0 %46 }
  0xba   :  { %v52_v14 = vsel %vm51_vm1, %v47_v13, 0.0 }
  0xbb   :  { %54 = vst.msk [vmem:[%s173_s2] sm:$0xff] %vm53_vm0, %v52_v14 }
  0xbc   :  { %65 = vsyncpa [#allocation3], 1 }
  0xbd   :  { %66 = vsyncpa [#allocation5], 1 }

</bundles_post_ra>
